<compile_context>
chip_gen: v6e
topology: v6e:2x2x1
jax: 0.10.0
libtpu: 0.0.40
codegen_flags: <defaults>
</compile_context>

<pallas_src>
import functools

import numpy as np

import jax
import jax.numpy as jnp
from jax.experimental import pallas as pl
from jax.experimental.pallas import tpu as pltpu


def _round_up(x, m):
    return -(-x // m) * m


def _diag_gaussian_kernel(x_ref, w_ref, b_ref, mean_ref, *, norm_actions_pre_sampling):
    # x_ref: [tb, K]        (streamed batch tile, bf16 or f32)
    # w_ref: [K, N]         (resident weight, pre-transposed once in the wrapper)
    # b_ref: [1, N] f32     (resident bias)
    # mean_ref: [tb, N] f32
    z = jnp.dot(x_ref[...], w_ref[...], preferred_element_type=jnp.float32)  # MXU, f32 acc
    z = z + b_ref[...]                       # f32 bias add (VPU)
    if norm_actions_pre_sampling:
        z = jnp.tanh(z)                      # f32 tanh on the EUP slot — ~free next to MXU
    mean_ref[...] = z.astype(mean_ref.dtype)


def _pick_batch_tile(batch, num_inputs, num_outputs, in_itemsize,
                     max_tile=16384, vmem_budget=28 << 20):
    """Largest batch tile whose *padded* VMEM footprint fits the budget.

    Padding model: last dim pads to 128 lanes; sublanes pad to 8 (f32) / 16 (bf16).
    x and out tiles are double-buffered by the Pallas pipeline; weight/bias are
    single-buffered (pl.Buffered(1)) and counted once.
    """
    sub = 16 if in_itemsize == 2 else 8
    k_lanes = _round_up(num_inputs, 128)
    n_lanes = _round_up(num_outputs, 128)
    k_sub = _round_up(num_inputs, sub)

    def footprint(tb):
        x_tile = tb * k_lanes * in_itemsize              # padded [tb, K] input tile
        o_tile = _round_up(tb, 8) * n_lanes * 4          # padded [tb, N] f32 output tile
        resident = k_sub * n_lanes * in_itemsize + 8 * n_lanes * 4
        return 2 * (x_tile + o_tile) + resident          # 2x: double-buffered stream

    tb = _round_up(min(max_tile, batch), sub)
    while footprint(tb) > vmem_budget and tb > sub:
        tb = max(sub, _round_up(tb // 2, sub))

    # v7x megacore: for moderately large batches keep >= 2 grid steps so the
    # "parallel" batch axis actually lands on both TensorCores.
    if batch >= 4096 and tb >= batch:
        tb = _round_up(_round_up(batch, sub) // 2, sub)
    return tb


def _resident_spec(block_shape, index_map):
    """Constant-index operand: single-buffer it (a second buffer is wasted VMEM)."""
    try:
        return pl.BlockSpec(block_shape, index_map, pipeline_mode=pl.Buffered(1))
    except (AttributeError, TypeError):      # older Pallas without pipeline_mode
        return pl.BlockSpec(block_shape, index_map)


def diag_gaussian_forward(x, weight, bias, logstd, *,
                          norm_actions_pre_sampling=False,
                          min_std=1e-6,
                          compute_dtype=jnp.bfloat16,
                          max_batch_tile=16384,
                          vmem_budget_bytes=28 << 20,
                          use_pallas=None):
    """Pallas equivalent of DiagGaussian.forward.

    x:      [batch, num_inputs]            (float32)
    weight: [num_outputs, num_inputs]      (PyTorch nn.Linear layout)
    bias:   [num_outputs]
    logstd: [num_outputs]
    Returns (action_mean [batch, num_outputs] f32, std [num_outputs] f32) — the
    parameters of the Normal distribution the PyTorch module constructs.
    """
    batch, num_inputs = x.shape
    num_outputs = weight.shape[0]

    x = jnp.asarray(x, jnp.float32)
    weight = jnp.asarray(weight, jnp.float32)
    bias = jnp.asarray(bias, jnp.float32)
    logstd = jnp.asarray(logstd, jnp.float32)

    # std = max(min_std, exp(logstd)): tiny [N] elementwise — leave it to fused XLA.
    std = jnp.maximum(jnp.float32(min_std), jnp.exp(logstd))

    if use_pallas is None:
        # Tiny problems are dominated by custom-call overhead — use fused XLA.
        use_pallas = (batch * num_inputs * num_outputs) >= (1 << 20)

    if not use_pallas:
        mean = x @ weight.T + bias
        if norm_actions_pre_sampling:
            mean = jnp.tanh(mean)
        return mean, std

    # Pre-transpose the weight ONCE to [K, N]: plain MXU contraction in the kernel,
    # no per-grid-step XLU transpose of a constant operand.
    w_kn = weight.T
    if jnp.dtype(compute_dtype) == jnp.dtype(jnp.bfloat16):
        x_in = x.astype(jnp.bfloat16)
        w_in = w_kn.astype(jnp.bfloat16)
        itemsize = 2
    else:
        x_in, w_in = x, w_kn
        itemsize = 4
    b2 = bias.reshape(1, num_outputs)        # f32 bias, lane-dense [1, N]

    tb = _pick_batch_tile(batch, num_inputs, num_outputs, itemsize,
                          max_tile=max_batch_tile, vmem_budget=vmem_budget_bytes)
    padded_batch = _round_up(batch, tb)
    if padded_batch != batch:
        # cdiv + zero-pad the ragged tail (never a giant full-batch block).
        x_in = jnp.pad(x_in, ((0, padded_batch - batch), (0, 0)))
    grid = (padded_batch // tb,)

    kernel = functools.partial(
        _diag_gaussian_kernel,
        norm_actions_pre_sampling=norm_actions_pre_sampling,
    )

    cost = pl.CostEstimate(
        flops=2 * padded_batch * num_inputs * num_outputs,
        transcendentals=padded_batch * num_outputs if norm_actions_pre_sampling else 0,
        bytes_accessed=(padded_batch * num_inputs + num_inputs * num_outputs) * itemsize
                       + (num_outputs + padded_batch * num_outputs) * 4,
    )

    mean = pl.pallas_call(
        kernel,
        out_shape=jax.ShapeDtypeStruct((padded_batch, num_outputs), jnp.float32),
        grid=grid,
        in_specs=[
            pl.BlockSpec((tb, num_inputs), lambda i: (i, 0)),                 # streamed x
            _resident_spec((num_inputs, num_outputs), lambda i: (0, 0)),      # resident W
            _resident_spec((1, num_outputs), lambda i: (0, 0)),               # resident b
        ],
        out_specs=pl.BlockSpec((tb, num_outputs), lambda i: (i, 0)),
        compiler_params=pltpu.CompilerParams(
            dimension_semantics=("parallel",),   # batch axis: both TCs on v7x
            vmem_limit_bytes=40 << 20,           # > v5e's 16 MiB default, < v7x's 64 MiB
        ),
        cost_estimate=cost,
    )(x_in, w_in, b2)

    if padded_batch != batch:
        mean = mean[:batch]
    return mean, std


def init_diag_gaussian_params(key, num_inputs, num_outputs, init_std=1.0, gain=1.0):
    """Deterministic init matching the PyTorch module:
       init_normc_ on the weight, zeros bias, logstd = log(init_std)."""
    w = jax.random.normal(key, (num_outputs, num_inputs), jnp.float32)
    w = w * (gain / jnp.sqrt(jnp.sum(w * w, axis=1, keepdims=True)))
    b = jnp.zeros((num_outputs,), jnp.float32)
    logstd = jnp.full((num_outputs,), jnp.log(jnp.float32(init_std)), jnp.float32)
    return w, b, logstd


if __name__ == "__main__":
    key = jax.random.PRNGKey(0)
    k_x, k_p, k_x2 = jax.random.split(key, 3)

    batch, num_inputs, num_outputs = 8, 16, 8
    init_std = 0.5
    x = jax.random.normal(k_x, (batch, num_inputs), jnp.float32)
    w, b, logstd = init_diag_gaussian_params(k_p, num_inputs, num_outputs, init_std)

    # float64 reference on host (matches the PyTorch module's double() Linear).
    x64 = np.asarray(x, np.float64)
    w64 = np.asarray(w, np.float64)
    b64 = np.asarray(b, np.float64)
    ref_lin = x64 @ w64.T + b64
    ref_tanh = np.tanh(ref_lin)
    ref_std = np.maximum(1e-6, np.exp(np.asarray(logstd, np.float64)))

    # 1) f32 compute path, tanh epilogue (forced Pallas at this tiny size).
    mean, std = diag_gaussian_forward(
        x, w, b, logstd, norm_actions_pre_sampling=True,
        compute_dtype=jnp.float32, use_pallas=True)
    mean, std = jax.block_until_ready((mean, std))
    assert mean.shape == (batch, num_outputs)
    assert std.shape == (num_outputs,)
    assert np.allclose(np.asarray(mean, np.float64), ref_tanh, atol=2e-2), "f32 mean mismatch"
    assert np.allclose(np.asarray(std, np.float64), ref_std, atol=1e-6), "std mismatch"

    # 2) default bf16-in / f32-accumulate path, untransformed mean.
    mean_bf, _ = diag_gaussian_forward(
        x, w, b, logstd, norm_actions_pre_sampling=False, use_pallas=True)
    mean_bf = jax.block_until_ready(mean_bf)
    assert np.allclose(np.asarray(mean_bf, np.float64), ref_lin, atol=5e-2), "bf16 mean mismatch"

    # 3) ragged batch (20 rows) with a small forced tile -> exercises cdiv+pad path.
    batch2 = 20
    x2 = jax.random.normal(k_x2, (batch2, num_inputs), jnp.float32)
    mean2, _ = diag_gaussian_forward(
        x2, w, b, logstd, norm_actions_pre_sampling=True,
        compute_dtype=jnp.float32, max_batch_tile=8, use_pallas=True)
    mean2 = jax.block_until_ready(mean2)
    ref2 = np.tanh(np.asarray(x2, np.float64) @ w64.T + b64)
    assert mean2.shape == (batch2, num_outputs)
    assert np.allclose(np.asarray(mean2, np.float64), ref2, atol=2e-2), "padded-batch mean mismatch"

    print("KERNEL_OK")
</pallas_src>

<mosaic_0001>
module attributes {stable_mosaic.version = 11 : i64} {
  func.func @_diag_gaussian_kernel(%arg0: i32, %arg1: memref<8x16xf32, #tpu.memory_space<vmem>>, %arg2: memref<16x8xf32, #tpu.memory_space<vmem>>, %arg3: memref<1x8xf32, #tpu.memory_space<vmem>>, %arg4: memref<8x8xf32, #tpu.memory_space<vmem>>) attributes {dimension_semantics = [#tpu.dimension_semantics<parallel>], iteration_bounds = array<i64: 1>, scalar_prefetch = 0 : i64, scratch_operands = 0 : i64, tpu.core_type = #tpu.core_type<tc>, window_params = [{transform_indices = @transform_0, window_bounds = array<i64: 8, 16>}, {pipeline_mode = #tpu.pipeline_mode<synchronous>, transform_indices = @transform_1, window_bounds = array<i64: 16, 8>}, {pipeline_mode = #tpu.pipeline_mode<synchronous>, transform_indices = @transform_2, window_bounds = array<i64: 1, 8>}, {transform_indices = @transform_3, window_bounds = array<i64: 8, 8>}]} {
    %c0 = arith.constant 0 : index
    %c0_0 = arith.constant 0 : index
    %0 = vector.load %arg1[%c0, %c0_0] : memref<8x16xf32, #tpu.memory_space<vmem>>, vector<8x16xf32>
    %c0_1 = arith.constant 0 : index
    %c0_2 = arith.constant 0 : index
    %1 = vector.load %arg2[%c0_1, %c0_2] : memref<16x8xf32, #tpu.memory_space<vmem>>, vector<16x8xf32>
    %cst = arith.constant dense<0.000000e+00> : vector<8x8xf32>
    %2 = tpu.matmul %0, %1, %cst {dimension_numbers = #tpu.dot_dimension_numbers<[1], [0], [0], [1], [0, 0, 1, 1], [], []>} : vector<8x16xf32>, vector<16x8xf32>, vector<8x8xf32> -> vector<8x8xf32>
    %c0_3 = arith.constant 0 : index
    %c0_4 = arith.constant 0 : index
    %3 = vector.load %arg3[%c0_3, %c0_4] : memref<1x8xf32, #tpu.memory_space<vmem>>, vector<1x8xf32>
    %4 = vector.broadcast %3 : vector<1x8xf32> to vector<8x8xf32>
    %5 = arith.addf %2, %4 : vector<8x8xf32>
    %6 = math.tanh %5 : vector<8x8xf32>
    %c0_5 = arith.constant 0 : index
    %c0_6 = arith.constant 0 : index
    %7 = vector.load %arg4[%c0_5, %c0_6] : memref<8x8xf32, #tpu.memory_space<vmem>>, vector<8x8xf32>
    tpu.vector_store %arg4[%c0_5, %c0_6], %6 {strides = array<i32>} : memref<8x8xf32, #tpu.memory_space<vmem>>, vector<8x8xf32>,
    return
  }
  func.func @transform_0(%arg0: i32) -> (i32, i32) {
    %c0_i32 = arith.constant 0 : i32
    %c0_i32_0 = arith.constant 0 : i32
    return %arg0, %c0_i32 : i32, i32
  }
  func.func @transform_1(%arg0: i32) -> (i32, i32) {
    %c0_i32 = arith.constant 0 : i32
    %c0_i32_0 = arith.constant 0 : i32
    %c0_i32_1 = arith.constant 0 : i32
    return %c0_i32, %c0_i32_0 : i32, i32
  }
  func.func @transform_2(%arg0: i32) -> (i32, i32) {
    %c0_i32 = arith.constant 0 : i32
    %c0_i32_0 = arith.constant 0 : i32
    %c0_i32_1 = arith.constant 0 : i32
    return %c0_i32, %c0_i32_0 : i32, i32
  }
  func.func @transform_3(%arg0: i32) -> (i32, i32) {
    %c0_i32 = arith.constant 0 : i32
    %c0_i32_0 = arith.constant 0 : i32
    return %arg0, %c0_i32 : i32, i32
  }
}

</mosaic_0001>

<bundles_post_ra>
// kernel: tpu_custom_call.1
= control target key start
LH: loop header
LB: loop body
LE: loop exit
PB: predicated region body
PF: predicated region fallthrough
CT: control target
= control target key end

     0   :  { %v155_v1 = vmov 0.0   ;;  %vm156_vm0 = vmmov 0   ;;  %s193_s0 = inlined_call_operand.vmem [shape: f32[8,16], index: 0, kind: input, shape index: {}]   ;;  %s194_s1 = inlined_call_operand.vmem [shape: f32[16,8], index: 1, kind: input, shape index: {}]   ;;  %s195_s2 = inlined_call_operand.vmem [shape: f32[1,8], index: 2, kind: input, shape index: {}]   ;;  %s196_s3 = inlined_call_operand.hbm [shape: f32[8,8], index: 3, kind: output, shape index: {}]  }
   0x1   :  { %v17_v0 = vld [vmem:[%s194_s1 + $0x8] sm:$0xff]  ;;  %121 = vmatprep.subr.mxu0 %v155_v1  ;;  %v16_v2 = vld [vmem:[%s194_s1] sm:$0xff]  ;;  %125 = vmatprep.mubr.msk.f32.mxu0 %vm156_vm0, %v155_v1 }
   0x2   :  { %8 = vsyncpa [#allocation3], 0  ;;  %122 = vmatpush3.msra.mxu0 %v17_v0  ;;  %v15_v3 = vld [vmem:[%s193_s0] sm:$0xff]  ;;  %vm25_vm1 = vcmask 130048   ;;  %s157_s1 = smov [#allocation2]   ;;  %vm100_vm2 = vcmask 64512  }
   0x3   :  { %123 = vmatprep.subr.mxu0 %v155_v1  ;;  %v116_v4 = vld [vmem:[%s195_s2] ss:$0 sm:$0xff]  ;;  %s108_s20 = sshll.u32 %s157_s1, 4  ;;  %s109_s20 = int_to_ptr.vmem [resolvable:$true] %s108_s20 }
   0x4   :  { %124 = vmatpush3.msra.mxu0 %v16_v2  ;;  %s133_s21 = scalar_lea.vmem %s109_s20, 128  ;;  %p138_p1 = scmp.lt.s32.totalorder %s109_s20, %s109_s20 }
   0x5   :  { %126 = vmatmul.mubr.msk.f32.vlgmr.msra.gmra.mxu0 %vm25_vm1, %v15_v3  ;;  %p134_p0 = scmp.ne.s32.totalorder %s109_s20, %s133_s21  ;;  %p139_p2 = scmp.lt.s32.totalorder %s133_s21, %s133_s21 }
   0x7   :  { %p140_p3 = por %p139_p2, %p138_p1 }
   0x9   :  { %p141_p4 = pnand %p140_p3, %p134_p0 }
  0xc5   :  { %v95_v5 = vpop.f32.mrf.mxu0 }
  0xc6   :  { %v96_v6 = vadd.f32 %v116_v4, %v95_v5 }
  0xc7   :  { %v127_v7 = vpop.f32.mrf.mxu0 }
  0xc8   :  { %131 = vtanh.f32 %v96_v6 }
  0xd5   :  { %v132_v8 = vpop.eup %131 }
  0xd6   :  { %101 = vst.msk [vmem:[#allocation2] sm:$0xff] %vm100_vm2, %v132_v8 }
  0xd7   :  { %144 = shalt.err (!%p141_p4)
}
  0xd8   :  { %111 = dma.vmem_to_hbm [thread:$0]  %s109_s20, 128, %s196_s3, [#allocation3]  }
  0xd9   :  { %153 = dma.done.wait [#allocation3], 128  }
  0xda   :  { %154 = vsyncadd [#allocation3], 4294967168 }
  0xdb   :  { %115 = vsyncpa [#allocation3], 1 }

</bundles_post_ra>
